<compile_context>
chip_gen: v7x
topology: tpu7x:2x2x1
jax: 0.10.0
libtpu: 0.0.40
codegen_flags: <defaults>
</compile_context>

<pallas_src>
import jax
import jax.numpy as jnp
from jax.experimental import pallas as pl
from jax.experimental.pallas import tpu as pltpu


def mlp_kernel(xt_ref, w1_ref, b1_ref, w2_ref, b2_ref, ot_ref):
    # xt_ref: (in_dim, TB)     -- batch tile on lanes
    # w1_ref: (hidden, in_dim) -- torch fc1.weight layout
    # b1_ref: (hidden, 1)
    # w2_ref: (out_dim, hidden)-- torch fc2.weight layout
    # b2_ref: (out_dim, 1)
    # ot_ref: (out_dim, TB)
    xt = xt_ref[...]
    w1 = w1_ref[...]
    w2 = w2_ref[...]

    in_dim, tb = xt.shape
    hidden = w1.shape[0]
    out_dim = w2.shape[0]

    # fc1 + bias: h[j, b] = sum_k w1[j, k] * x[k, b] + b1[j]
    # K = in_dim = 2 -> two VPU broadcast-mul-adds, no MXU involved.
    h = jnp.broadcast_to(b1_ref[...], (hidden, tb))
    for k in range(in_dim):  # static unroll
        h = h + w1[:, k:k + 1] * xt[k:k + 1, :]
    h = jnp.maximum(h, 0.0)  # ReLU on the VPU

    # fc2 + bias: out[o, b] = sum_j w2[o, j] * h[j, b] + b2[o]
    # K = hidden = 6 -> six VPU broadcast-mul-adds.
    out = jnp.broadcast_to(b2_ref[...], (out_dim, tb))
    for j in range(hidden):  # static unroll
        out = out + w2[:, j:j + 1] * h[j:j + 1, :]

    ot_ref[...] = out.astype(ot_ref.dtype)


def mynet_forward(x, w1, b1, w2, b2, *, tb=256):
    """x: [B, in_dim]; w1: [hidden, in_dim]; b1: [hidden];
    w2: [out_dim, hidden]; b2: [out_dim]  (torch nn.Linear layouts)."""
    B, in_dim = x.shape
    hidden = w1.shape[0]
    out_dim = w2.shape[0]

    tb = max(128, tb)
    n_tiles = pl.cdiv(B, tb)
    Bp = n_tiles * tb

    # Batch-on-lanes layout: [in_dim, B], zero-padded to a multiple of the tile.
    xt = jnp.zeros((in_dim, Bp), x.dtype).at[:, :B].set(x.T)
    b1c = b1.reshape(hidden, 1)
    b2c = b2.reshape(out_dim, 1)

    out_t = pl.pallas_call(
        mlp_kernel,
        out_shape=jax.ShapeDtypeStruct((out_dim, Bp), x.dtype),
        grid=(n_tiles,),
        in_specs=[
            # streamed batch tile (lane-dense)
            pl.BlockSpec((in_dim, tb), lambda i: (0, i)),
            # weights / biases: constant index_map -> resident in VMEM
            pl.BlockSpec((hidden, in_dim), lambda i: (0, 0)),
            pl.BlockSpec((hidden, 1), lambda i: (0, 0)),
            pl.BlockSpec((out_dim, hidden), lambda i: (0, 0)),
            pl.BlockSpec((out_dim, 1), lambda i: (0, 0)),
        ],
        out_specs=pl.BlockSpec((out_dim, tb), lambda i: (0, i)),
        compiler_params=pltpu.CompilerParams(
            dimension_semantics=("parallel",),  # shard batch tiles over TCs (v7x)
        ),
    )(xt, w1, b1c, w2, b2c)

    return out_t[:, :B].T


mynet_forward = jax.jit(mynet_forward, static_argnames=("tb",))


def reference_forward(x, w1, b1, w2, b2):
    h = jnp.maximum(x @ w1.T + b1, 0.0)
    return h @ w2.T + b2


if __name__ == "__main__":
    input_dim, hidden_dim, output_dim = 2, 6, 2
    batch = 1000  # not a multiple of the tile -> exercises host-side padding

    key = jax.random.PRNGKey(0)
    kx, k1, k2, k3, k4 = jax.random.split(key, 5)

    # torch.nn.Linear-style init, torch weight layouts ([out_features, in_features]).
    bound1 = 1.0 / jnp.sqrt(input_dim)
    bound2 = 1.0 / jnp.sqrt(hidden_dim)
    w1 = jax.random.uniform(k1, (hidden_dim, input_dim), jnp.float32, -bound1, bound1)
    b1 = jax.random.uniform(k2, (hidden_dim,), jnp.float32, -bound1, bound1)
    w2 = jax.random.uniform(k3, (output_dim, hidden_dim), jnp.float32, -bound2, bound2)
    b2 = jax.random.uniform(k4, (output_dim,), jnp.float32, -bound2, bound2)

    x = jax.random.normal(kx, (batch, input_dim), jnp.float32)

    out = mynet_forward(x, w1, b1, w2, b2)
    out = jax.block_until_ready(out)

    ref = reference_forward(x, w1, b1, w2, b2)
    assert out.shape == (batch, output_dim)
    assert jnp.allclose(out, ref, atol=1e-5, rtol=1e-5), "mismatch vs reference"

    print("KERNEL_OK")
</pallas_src>

<mosaic_0001>
module attributes {stable_mosaic.version = 11 : i64} {
  func.func @mlp_kernel(%arg0: i32, %arg1: memref<2x256xf32, #tpu.memory_space<vmem>>, %arg2: memref<6x2xf32, #tpu.memory_space<vmem>>, %arg3: memref<6x1xf32, #tpu.memory_space<vmem>>, %arg4: memref<2x6xf32, #tpu.memory_space<vmem>>, %arg5: memref<2x1xf32, #tpu.memory_space<vmem>>, %arg6: memref<2x256xf32, #tpu.memory_space<vmem>>) attributes {dimension_semantics = [#tpu.dimension_semantics<parallel>], iteration_bounds = array<i64: 4>, scalar_prefetch = 0 : i64, scratch_operands = 0 : i64, tpu.core_type = #tpu.core_type<tc>, window_params = [{transform_indices = @transform_0, window_bounds = array<i64: 2, 256>}, {pipeline_mode = #tpu.pipeline_mode<synchronous>, transform_indices = @transform_1, window_bounds = array<i64: 6, 2>}, {pipeline_mode = #tpu.pipeline_mode<synchronous>, transform_indices = @transform_2, window_bounds = array<i64: 6, 1>}, {pipeline_mode = #tpu.pipeline_mode<synchronous>, transform_indices = @transform_3, window_bounds = array<i64: 2, 6>}, {pipeline_mode = #tpu.pipeline_mode<synchronous>, transform_indices = @transform_4, window_bounds = array<i64: 2, 1>}, {transform_indices = @transform_5, window_bounds = array<i64: 2, 256>}]} {
    %c0 = arith.constant 0 : index
    %c0_0 = arith.constant 0 : index
    %0 = vector.load %arg1[%c0, %c0_0] : memref<2x256xf32, #tpu.memory_space<vmem>>, vector<2x256xf32>
    %c0_1 = arith.constant 0 : index
    %c0_2 = arith.constant 0 : index
    %1 = vector.load %arg2[%c0_1, %c0_2] : memref<6x2xf32, #tpu.memory_space<vmem>>, vector<6x2xf32>
    %c0_3 = arith.constant 0 : index
    %c0_4 = arith.constant 0 : index
    %2 = vector.load %arg4[%c0_3, %c0_4] : memref<2x6xf32, #tpu.memory_space<vmem>>, vector<2x6xf32>
    %c0_5 = arith.constant 0 : index
    %c0_6 = arith.constant 0 : index
    %3 = vector.load %arg3[%c0_5, %c0_6] : memref<6x1xf32, #tpu.memory_space<vmem>>, vector<6x1xf32>
    %4 = vector.shape_cast %3 : vector<6x1xf32> to vector<6x1xf32>
    %5 = vector.broadcast %4 : vector<6x1xf32> to vector<6x256xf32>
    %6 = vector.extract_strided_slice %1 {offsets = [0, 0], sizes = [6, 1], strides = [1, 1]} : vector<6x2xf32> to vector<6x1xf32>
    %7 = vector.extract_strided_slice %0 {offsets = [0, 0], sizes = [1, 256], strides = [1, 1]} : vector<2x256xf32> to vector<1x256xf32>
    %8 = vector.broadcast %6 : vector<6x1xf32> to vector<6x256xf32>
    %9 = vector.broadcast %7 : vector<1x256xf32> to vector<6x256xf32>
    %10 = arith.mulf %8, %9 : vector<6x256xf32>
    %11 = arith.addf %5, %10 : vector<6x256xf32>
    %12 = vector.extract_strided_slice %1 {offsets = [0, 1], sizes = [6, 1], strides = [1, 1]} : vector<6x2xf32> to vector<6x1xf32>
    %13 = vector.extract_strided_slice %0 {offsets = [1, 0], sizes = [1, 256], strides = [1, 1]} : vector<2x256xf32> to vector<1x256xf32>
    %14 = vector.broadcast %12 : vector<6x1xf32> to vector<6x256xf32>
    %15 = vector.broadcast %13 : vector<1x256xf32> to vector<6x256xf32>
    %16 = arith.mulf %14, %15 : vector<6x256xf32>
    %17 = arith.addf %11, %16 : vector<6x256xf32>
    %cst = arith.constant 0.000000e+00 : f32
    %18 = vector.broadcast %cst : f32 to vector<6x256xf32>
    %19 = arith.maximumf %17, %18 : vector<6x256xf32>
    %c0_7 = arith.constant 0 : index
    %c0_8 = arith.constant 0 : index
    %20 = vector.load %arg5[%c0_7, %c0_8] : memref<2x1xf32, #tpu.memory_space<vmem>>, vector<2x1xf32>
    %21 = vector.shape_cast %20 : vector<2x1xf32> to vector<2x1xf32>
    %22 = vector.broadcast %21 : vector<2x1xf32> to vector<2x256xf32>
    %23 = vector.extract_strided_slice %2 {offsets = [0, 0], sizes = [2, 1], strides = [1, 1]} : vector<2x6xf32> to vector<2x1xf32>
    %24 = vector.extract_strided_slice %19 {offsets = [0, 0], sizes = [1, 256], strides = [1, 1]} : vector<6x256xf32> to vector<1x256xf32>
    %25 = vector.broadcast %23 : vector<2x1xf32> to vector<2x256xf32>
    %26 = vector.broadcast %24 : vector<1x256xf32> to vector<2x256xf32>
    %27 = arith.mulf %25, %26 : vector<2x256xf32>
    %28 = arith.addf %22, %27 : vector<2x256xf32>
    %29 = vector.extract_strided_slice %2 {offsets = [0, 1], sizes = [2, 1], strides = [1, 1]} : vector<2x6xf32> to vector<2x1xf32>
    %30 = vector.extract_strided_slice %19 {offsets = [1, 0], sizes = [1, 256], strides = [1, 1]} : vector<6x256xf32> to vector<1x256xf32>
    %31 = vector.broadcast %29 : vector<2x1xf32> to vector<2x256xf32>
    %32 = vector.broadcast %30 : vector<1x256xf32> to vector<2x256xf32>
    %33 = arith.mulf %31, %32 : vector<2x256xf32>
    %34 = arith.addf %28, %33 : vector<2x256xf32>
    %35 = vector.extract_strided_slice %2 {offsets = [0, 2], sizes = [2, 1], strides = [1, 1]} : vector<2x6xf32> to vector<2x1xf32>
    %36 = vector.extract_strided_slice %19 {offsets = [2, 0], sizes = [1, 256], strides = [1, 1]} : vector<6x256xf32> to vector<1x256xf32>
    %37 = vector.broadcast %35 : vector<2x1xf32> to vector<2x256xf32>
    %38 = vector.broadcast %36 : vector<1x256xf32> to vector<2x256xf32>
    %39 = arith.mulf %37, %38 : vector<2x256xf32>
    %40 = arith.addf %34, %39 : vector<2x256xf32>
    %41 = vector.extract_strided_slice %2 {offsets = [0, 3], sizes = [2, 1], strides = [1, 1]} : vector<2x6xf32> to vector<2x1xf32>
    %42 = vector.extract_strided_slice %19 {offsets = [3, 0], sizes = [1, 256], strides = [1, 1]} : vector<6x256xf32> to vector<1x256xf32>
    %43 = vector.broadcast %41 : vector<2x1xf32> to vector<2x256xf32>
    %44 = vector.broadcast %42 : vector<1x256xf32> to vector<2x256xf32>
    %45 = arith.mulf %43, %44 : vector<2x256xf32>
    %46 = arith.addf %40, %45 : vector<2x256xf32>
    %47 = vector.extract_strided_slice %2 {offsets = [0, 4], sizes = [2, 1], strides = [1, 1]} : vector<2x6xf32> to vector<2x1xf32>
    %48 = vector.extract_strided_slice %19 {offsets = [4, 0], sizes = [1, 256], strides = [1, 1]} : vector<6x256xf32> to vector<1x256xf32>
    %49 = vector.broadcast %47 : vector<2x1xf32> to vector<2x256xf32>
    %50 = vector.broadcast %48 : vector<1x256xf32> to vector<2x256xf32>
    %51 = arith.mulf %49, %50 : vector<2x256xf32>
    %52 = arith.addf %46, %51 : vector<2x256xf32>
    %53 = vector.extract_strided_slice %2 {offsets = [0, 5], sizes = [2, 1], strides = [1, 1]} : vector<2x6xf32> to vector<2x1xf32>
    %54 = vector.extract_strided_slice %19 {offsets = [5, 0], sizes = [1, 256], strides = [1, 1]} : vector<6x256xf32> to vector<1x256xf32>
    %55 = vector.broadcast %53 : vector<2x1xf32> to vector<2x256xf32>
    %56 = vector.broadcast %54 : vector<1x256xf32> to vector<2x256xf32>
    %57 = arith.mulf %55, %56 : vector<2x256xf32>
    %58 = arith.addf %52, %57 : vector<2x256xf32>
    %c0_9 = arith.constant 0 : index
    %c0_10 = arith.constant 0 : index
    %59 = vector.load %arg6[%c0_9, %c0_10] : memref<2x256xf32, #tpu.memory_space<vmem>>, vector<2x256xf32>
    tpu.vector_store %arg6[%c0_9, %c0_10], %58 {strides = array<i32>} : memref<2x256xf32, #tpu.memory_space<vmem>>, vector<2x256xf32>,
    return
  }
  func.func @transform_0(%arg0: i32) -> (i32, i32) {
    %c0_i32 = arith.constant 0 : i32
    %c0_i32_0 = arith.constant 0 : i32
    return %c0_i32, %arg0 : i32, i32
  }
  func.func @transform_1(%arg0: i32) -> (i32, i32) {
    %c0_i32 = arith.constant 0 : i32
    %c0_i32_0 = arith.constant 0 : i32
    %c0_i32_1 = arith.constant 0 : i32
    return %c0_i32, %c0_i32_0 : i32, i32
  }
  func.func @transform_2(%arg0: i32) -> (i32, i32) {
    %c0_i32 = arith.constant 0 : i32
    %c0_i32_0 = arith.constant 0 : i32
    %c0_i32_1 = arith.constant 0 : i32
    return %c0_i32, %c0_i32_0 : i32, i32
  }
  func.func @transform_3(%arg0: i32) -> (i32, i32) {
    %c0_i32 = arith.constant 0 : i32
    %c0_i32_0 = arith.constant 0 : i32
    %c0_i32_1 = arith.constant 0 : i32
    return %c0_i32, %c0_i32_0 : i32, i32
  }
  func.func @transform_4(%arg0: i32) -> (i32, i32) {
    %c0_i32 = arith.constant 0 : i32
    %c0_i32_0 = arith.constant 0 : i32
    %c0_i32_1 = arith.constant 0 : i32
    return %c0_i32, %c0_i32_0 : i32, i32
  }
  func.func @transform_5(%arg0: i32) -> (i32, i32) {
    %c0_i32 = arith.constant 0 : i32
    %c0_i32_0 = arith.constant 0 : i32
    return %c0_i32, %arg0 : i32, i32
  }
}

</mosaic_0001>

<bundles_post_ra>
// kernel: mynet_forward.1
= control target key start
LH: loop header
LB: loop body
LE: loop exit
PB: predicated region body
PF: predicated region fallthrough
CT: control target
= control target key end

     0   :  { %s542_s18 = smov 0   ;;  %s580_s0 = inlined_call_operand.vmem [shape: f32[2,1024], index: 0, kind: input, shape index: {}]   ;;  %s581_s1 = inlined_call_operand.vmem [shape: f32[6,2], index: 1, kind: input, shape index: {}]   ;;  %s582_s2 = inlined_call_operand.vmem [shape: f32[6,1], index: 2, kind: input, shape index: {}]   ;;  %s583_s3 = inlined_call_operand.vmem [shape: f32[2,6], index: 3, kind: input, shape index: {}]   ;;  %s584_s4 = inlined_call_operand.vmem [shape: f32[2,1], index: 4, kind: input, shape index: {}]   ;;  %s585_s5 = inlined_call_operand.vmem [shape: f32[2,1024], index: 5, kind: output, shape index: {}]  }
   0x1 LB: > { %s464_s19 = sadd.s32 4294967295, %s504_s18   ;;  %p468_p0 = scmp.ge.s32.totalorder %s504_s18, 1  ;;  %s504_s18 = sphi %s542_s18, %s15_s18  }
   0x2   : > { %p188_p1 = scmp.lt.s32.totalorder %s504_s18, 5 }
   0x4   : > { %p189_p2 = pnand %p468_p0, %p188_p1 }
   0x5   : > { %v229_v0 = vld [vmem:[%s581_s1] sm:$0x3f] (!%p189_p2)  ;;  %v506_v1 = vmov (!%p189_p2), 1   ;;  %v507_v2 = vmov (!%p189_p2), 0   ;;  %v508_v6 = vmov (!%p189_p2), 2   ;;  %v509_v7 = vmov (!%p189_p2), 3  }
   0x6   : > { %192 = sbr.rel (%p189_p2) target bundleno = 164 (0xa4), region = 40  ;;  %491 = vset.pattern.permute.xlu1 (!%p189_p2), %v506_v1  ;;  %490 = vset.pattern.permute.xlu0 (!%p189_p2), %v507_v2  ;;  %v231_v3 = vld [vmem:[%s582_s2] sm:$0x3f] (!%p189_p2)  ;;  %v510_v8 = vmov (!%p189_p2), 5   ;;  %v511_v9 = vmov (!%p189_p2), 4   ;;  %s469_s28 = sshll.u32 (!%p189_p2), %s464_s19, 1  ;;  %v243_v10 = vlaneseq (!%p189_p2) }
   0x7   : > { %266 = vperm.xlu1 (!%p189_p2), %491, %v229_v0   ;;  %239 = vperm.xlu0 (!%p189_p2), %490, %v229_v0   ;;  %v230_v4 = vld [vmem:[%s583_s3] sm:$0x3] (!%p189_p2)  ;;  %p217_p3 = scmp.lt.s32.totalorder (!%p189_p2), %s469_s28, 7 }
   0x8   : > { %v293_v5 = vld [vmem:[%s584_s4] sm:$0x3] (!%p189_p2)  ;;  %v244_v11 = vshrl.u32 (!%p189_p2), %v243_v10, 7 }
   0xa   : > { %v245_v12 = vsub.s32 (!%p189_p2), 0, %v244_v11  ;;  %v249_v13 = vsub.s32 (!%p189_p2), 2, %v244_v11  ;;  %v271_v15 = vsub.s32 (!%p189_p2), 1, %v244_v11  ;;  %v275_v16 = vsub.s32 (!%p189_p2), 3, %v244_v11 }
   0xb   : > { %492 = vset.pattern.permute.xlu1 (!%p189_p2), %v507_v2  ;;  %234 = vperm.xlu0 (!%p189_p2), %490, %v231_v3   ;;  %v370_v50 = vsub.s32 (!%p189_p2), 4, %v244_v11  ;;  %v386_v58 = vsub.s32 (!%p189_p2), 5, %v244_v11 }
   0xc   : > { %301 = vperm.xlu1 (!%p189_p2), %492, %v230_v4  }
   0xd   : > { %s587_s28 = smov (!%p217_p3, %s469_s28), 7 }
   0xe   : > { %s470_s29 = sshll.u32 %s587_s28, 1 }
   0xf   : > { %296 = vperm.xlu0 %490, %v293_v5   ;;  %s220_s7 = scalar_lea.vmem %s580_s0, %s470_s29  ;;  %s226_s10 = scalar_lea.vmem %s585_s5, %s470_s29 }
  0x10   : > { %493 = vset.pattern.permute.xlu1 %v506_v1  ;;  %v228_v14 = vld [vmem:[%s220_s7] sm:$0xf] }
  0x11   : > { %317 = vperm.xlu1 %493, %v230_v4   ;;  %v246_v17 = vrot.slane %v228_v14, %v245_v12  ;;  %v250_v18 = vrot.slane %v228_v14, %v249_v13  ;;  %v272_v19 = vrot.slane %v228_v14, %v271_v15  ;;  %v276_v20 = vrot.slane %v228_v14, %v275_v16 }
  0x13   : > { %494 = vset.pattern.permute.xlu0 %v508_v6  ;;  %v256_v21 = vrot.slane %v246_v17, %v245_v12  ;;  %v260_v22 = vrot.slane %v250_v18, %v245_v12  ;;  %v282_v25 = vrot.slane %v272_v19, %v271_v15  ;;  %v286_v26 = vrot.slane %v276_v20, %v271_v15 }
  0x14   : > { %333 = vperm.xlu0 %494, %v230_v4  }
  0x15   : > { %495 = vset.pattern.permute.xlu1 %v509_v7 }
  0x16   : > { %349 = vperm.xlu1 %495, %v230_v4  }
  0x18   : > { %497 = vset.pattern.permute.xlu0 %v510_v8 }
  0x19   : > { %381 = vperm.xlu0 %497, %v230_v4  }
  0x1a   : > { %496 = vset.pattern.permute.xlu1 %v511_v9 }
  0x1b   : > { %365 = vperm.xlu1 %496, %v230_v4  }
  0x86   : > { %v267_v23 = vpop.permute.xlu1 %266  ;;  %v240_v24 = vpop.permute.xlu0 %239 }
  0x87   : > { %v261_v27 = vmul.f32 %v256_v21, %v240_v24  ;;  %v262_v28 = vmul.f32 %v260_v22, %v240_v24  ;;  %v287_v30 = vmul.f32 %v282_v25, %v267_v23  ;;  %v288_v31 = vmul.f32 %v286_v26, %v267_v23 }
  0x8a   : > { %v235_v29 = vpop.permute.xlu0 %234 }
  0x8b   : > { %v263_v32 = vadd.f32 %v261_v27, %v235_v29  ;;  %v264_v33 = vadd.f32 %v262_v28, %v235_v29  ;;  %v302_v34 = vpop.permute.xlu1 %301 }
  0x8d   : > { %v289_v35 = vadd.f32 %v287_v30, %v263_v32  ;;  %v290_v36 = vadd.f32 %v288_v31, %v264_v33 }
  0x8e   : > { %v297_v37 = vpop.permute.xlu0 %296 }
  0x8f   : > { %v291_v38 = vmax.f32 %v289_v35, 0.0  ;;  %v292_v39 = vmax.f32 %v290_v36, 0.0 }
  0x90   : > { %v318_v40 = vpop.permute.xlu1 %317 }
  0x91   : > { %v307_v41 = vrot.slane %v291_v38, %v245_v12  ;;  %v311_v42 = vrot.slane %v292_v39, %v245_v12  ;;  %v323_v43 = vrot.slane %v291_v38, %v271_v15  ;;  %v327_v44 = vrot.slane %v292_v39, %v271_v15 }
  0x92   : > { %v339_v47 = vrot.slane %v291_v38, %v249_v13  ;;  %v343_v48 = vrot.slane %v292_v39, %v249_v13  ;;  %v355_v56 = vrot.slane %v291_v38, %v275_v16  ;;  %v359_v57 = vrot.slane %v292_v39, %v275_v16 }
  0x93   : > { %v312_v45 = vmul.f32 %v307_v41, %v302_v34  ;;  %v313_v46 = vmul.f32 %v311_v42, %v302_v34  ;;  %v334_v49 = vpop.permute.xlu0 %333  ;;  %v328_v53 = vmul.f32 %v323_v43, %v318_v40  ;;  %v329_v54 = vmul.f32 %v327_v44, %v318_v40 }
  0x94   : > { %v344_v61 = vmul.f32 %v339_v47, %v334_v49  ;;  %v345_v62 = vmul.f32 %v343_v48, %v334_v49  ;;  %v371_v63 = vrot.slane %v291_v38, %v370_v50  ;;  %v375_v0 = vrot.slane %v292_v39, %v370_v50 }
  0x95   : > { %v314_v51 = vadd.f32 %v312_v45, %v297_v37  ;;  %v315_v52 = vadd.f32 %v313_v46, %v297_v37  ;;  %v350_v55 = vpop.permute.xlu1 %349  ;;  %v387_v6 = vrot.slane %v291_v38, %v386_v58  ;;  %v391_v7 = vrot.slane %v292_v39, %v386_v58 }
  0x96   : > { %v360_v3 = vmul.f32 %v355_v56, %v350_v55  ;;  %v361_v4 = vmul.f32 %v359_v57, %v350_v55 }
  0x97   : > { %v330_v59 = vadd.f32 %v328_v53, %v314_v51  ;;  %v331_v60 = vadd.f32 %v329_v54, %v315_v52 }
  0x98   : > { %v382_v5 = vpop.permute.xlu0 %381 }
  0x99   : > { %v346_v1 = vadd.f32 %v344_v61, %v330_v59  ;;  %v347_v2 = vadd.f32 %v345_v62, %v331_v60  ;;  %v392_v11 = vmul.f32 %v387_v6, %v382_v5  ;;  %v393_v14 = vmul.f32 %v391_v7, %v382_v5 }
  0x9a   : > { %v366_v8 = vpop.permute.xlu1 %365 }
  0x9b   : > { %v362_v9 = vadd.f32 %v360_v3, %v346_v1  ;;  %v363_v10 = vadd.f32 %v361_v4, %v347_v2  ;;  %v376_v12 = vmul.f32 %v371_v63, %v366_v8  ;;  %v377_v13 = vmul.f32 %v375_v0, %v366_v8 }
  0x9d   : > { %v378_v15 = vadd.f32 %v376_v12, %v362_v9  ;;  %v379_v16 = vadd.f32 %v377_v13, %v363_v10 }
  0x9f   : > { %v394_v17 = vadd.f32 %v392_v11, %v378_v15  ;;  %v395_v18 = vadd.f32 %v393_v14, %v379_v16 }
  0xa1   : > { %v398_v19 = vcombine.low %v394_v17, %v395_v18 }
  0xa3   : > { %473 = vst.sshfl [vmem:[%s226_s10] sm:$0x33 pattern:$0x76325410] %v398_v19 }
  0xa4 PF: > { %s15_s18 = sadd.s32 1, %s504_s18  }
  0xa5   : > { %p12_p4 = scmp.ge.s32.totalorder %s15_s18, 6  }
  0xa7   :  { %14 = sbr.rel (!%p12_p4) target bundleno = 1 (0x1), region = 70 }

</bundles_post_ra>
